<compile_context>
chip_gen: v6e
topology: v6e:2x2x1
jax: 0.10.0
libtpu: 0.0.40
codegen_flags: <defaults>
</compile_context>

<pallas_src>
import jax
import jax.numpy as jnp
from jax import lax
from jax.experimental import pallas as pl
from jax.experimental.pallas import tpu as pltpu


def _round_up(n, m):
    return -(-n // m) * m


def _pick_t_tile(T, C_in, C_out, K, P, in_itemsize, out_itemsize, vmem_budget):
    """Largest 128-multiple time tile fitting the per-generation VMEM budget.

    Prefers a tile that divides T exactly (avoids a ragged, partially-masked
    last tile).  Counts double-buffered x/out blocks, the haloed window
    scratch, the resident weight/bias and the tiny halo blocks.
    """
    lpad = _round_up(P, 128) if P > 0 else 0
    fixed = 2 * K * C_out * C_in * in_itemsize          # resident weight (dbl-buffered)
    fixed += 2 * C_out * 4                              # resident bias (f32)
    fixed += 2 * C_in * max(P, 1) * in_itemsize         # halo blocks
    fixed += C_in * lpad * in_itemsize                  # halo lanes of the window scratch
    per_col = 3 * C_in * in_itemsize + 2 * C_out * out_itemsize  # x(x2) + window + out(x2)

    if T <= 128:
        return T
    if T <= 512 and fixed + T * per_col <= vmem_budget:
        return T

    min_tile = max(128, _round_up(P, 128))              # need >= P halo columns per tile
    avail = max(vmem_budget - fixed, 128 * per_col)
    max_tile = max(min_tile, min((avail // per_col) // 128 * 128, 2048))
    top = max(min_tile, min(max_tile, _round_up(T, 128)))
    for cand in range(top, min_tile - 1, -128):
        if T % cand == 0:
            return cand
    return top


def _make_conv_kernel(K, t_tile, P, lpad, dilation, out_dtype):
    base = lpad - P

    def kernel(x_ref, halo_ref, w_ref, b_ref, o_ref, win_ref):
        # One contiguous haloed window: [ ... pad ... | halo (P) | x tile (t_tile) ]
        # The x-tile store lands at lane offset `lpad` (multiple of 128) -> full,
        # unmasked vector stores; the halo store is a tiny masked store.
        win_ref[:, base:lpad] = halo_ref[0, 0]
        win_ref[:, lpad:] = x_ref[0]
        # K accumulating MXU dots on lane-offset slices of the window (f32 acc).
        acc = jnp.dot(w_ref[0], win_ref[:, base:base + t_tile],
                      preferred_element_type=jnp.float32)
        for kk in range(1, K):
            off = base + kk * dilation
            acc += jnp.dot(w_ref[kk], win_ref[:, off:off + t_tile],
                           preferred_element_type=jnp.float32)
        o_ref[0] = (acc + b_ref[...]).astype(out_dtype)

    return kernel


def _make_pointwise_kernel(out_dtype):
    def kernel(x_ref, w_ref, b_ref, o_ref):
        acc = jnp.dot(w_ref[0], x_ref[0], preferred_element_type=jnp.float32)
        o_ref[0] = (acc + b_ref[...]).astype(out_dtype)

    return kernel


def causal_conv1d(x, weight, bias=None, *, stride=1, dilation=1,
                  pad_mode="reflect", t_tile=None, compute_dtype=None):
    """x: (B, C_in, T), weight: (C_out, C_in, K), bias: (C_out,) -> (B, C_out, T_out)."""
    B, C_in, T = x.shape
    C_out, C_in_w, K = weight.shape
    assert C_in_w == C_in
    out_dtype = x.dtype
    if bias is None:
        bias = jnp.zeros((C_out,), dtype=jnp.float32)

    causal_padding = dilation * (K - 1) + (1 - stride)

    if stride != 1:
        # TODO(synk): stride > 1 keeps an XLA conv fallback (phase-split Pallas path not implemented).
        if causal_padding >= 0:
            x_in = jnp.pad(x, ((0, 0), (0, 0), (causal_padding, 0)), mode=pad_mode)
        else:
            x_in = x[:, :, -causal_padding:]  # F.pad with a negative pad crops from the left
        out = lax.conv_general_dilated(
            x_in, weight, window_strides=(stride,), padding="VALID",
            rhs_dilation=(dilation,), dimension_numbers=("NCH", "OIH", "NCH"))
        return (out + bias.reshape(1, -1, 1)).astype(out_dtype)

    if pad_mode not in ("reflect", "replicate", "constant"):
        raise ValueError(f"unsupported pad_mode: {pad_mode}")

    P = causal_padding  # = dilation * (K - 1) >= 0 for stride == 1
    if pad_mode == "reflect" and P > 0 and T <= P:
        raise ValueError("reflect padding requires T > causal_padding")

    # bf16 I/O halves HBM traffic (kernel is bandwidth-bound); f32 accumulation kept.
    if compute_dtype is None and out_dtype == jnp.bfloat16:
        compute_dtype = jnp.bfloat16
    x_c = x if compute_dtype is None else x.astype(compute_dtype)
    in_itemsize = jnp.dtype(x_c.dtype).itemsize
    out_itemsize = jnp.dtype(out_dtype).itemsize

    # Per-generation VMEM budget (3/4 of physical VMEM: ~96 MiB v5e/v6e, ~48 MiB v7x).
    try:
        vmem_cap = pltpu.get_tpu_info().vmem_capacity_bytes
    except Exception:
        vmem_cap = 64 * 1024 * 1024  # conservative (v7x-sized) fallback
    vmem_budget = int(max((vmem_cap * 3) // 4, 32 * 1024 * 1024))

    if t_tile is None:
        t_tile = _pick_t_tile(T, C_in, C_out, K, P, in_itemsize, out_itemsize, vmem_budget)
    assert t_tile == T or t_tile % 128 == 0, \
        "time tile must be the full T or a multiple of 128"
    assert t_tile <= _round_up(T, 128), "time tile must not exceed round_up(T, 128)"
    num_t = -(-T // t_tile)
    if num_t > 1:
        assert t_tile >= P, "time tile must be >= the causal padding when tiling time"

    # Weight as (K, C_out, C_in): tap kk is w3[kk]; grid-invariant (VMEM resident).
    w3 = jnp.transpose(weight, (2, 0, 1)).astype(x_c.dtype)
    bias2d = jnp.asarray(bias).reshape(C_out, 1).astype(jnp.float32)

    compiler_params = pltpu.CompilerParams(
        dimension_semantics=("parallel", "parallel"),
        vmem_limit_bytes=vmem_budget,
    )

    if P == 0:
        # Pointwise (K == 1) fast path: no halo, no window scratch.
        return pl.pallas_call(
            _make_pointwise_kernel(out_dtype),
            out_shape=jax.ShapeDtypeStruct((B, C_out, T), out_dtype),
            grid_spec=pltpu.PrefetchScalarGridSpec(
                num_scalar_prefetch=0,
                grid=(B, num_t),
                in_specs=[
                    pl.BlockSpec((1, C_in, t_tile), lambda b, t: (b, 0, t)),
                    pl.BlockSpec((K, C_out, C_in), lambda b, t: (0, 0, 0)),
                    pl.BlockSpec((C_out, 1), lambda b, t: (0, 0)),
                ],
                out_specs=pl.BlockSpec((1, C_out, t_tile), lambda b, t: (b, 0, t)),
            ),
            compiler_params=compiler_params,
        )(x_c, w3, bias2d)

    # --- P > 0: precompute per-tile left halos in the wrapper ----------------
    # halos[b, t] = the P "padded x" columns immediately left of time tile t:
    #   t == 0 -> reflect / replicate / constant boundary
    #   t  > 0 -> x[b, :, t*t_tile - P : t*t_tile]
    # Removing the sequential carry makes BOTH grid axes parallel.
    if pad_mode == "reflect":
        first = x_c[:, :, P:0:-1]                                   # padded[j] = x[P - j]
    elif pad_mode == "replicate":
        first = jnp.broadcast_to(x_c[:, :, :1], (B, C_in, P))
    else:  # constant (zeros)
        first = jnp.zeros((B, C_in, P), dtype=x_c.dtype)
    first = first[:, :, None, :]                                    # (B, C_in, 1, P)
    if num_t > 1:
        starts = jnp.arange(1, num_t, dtype=jnp.int32) * t_tile
        idx = starts[:, None] - P + jnp.arange(P, dtype=jnp.int32)[None, :]
        inner = jnp.take(x_c, idx, axis=2)                          # (B, C_in, num_t-1, P)
        halos = jnp.concatenate([first, inner], axis=2)
    else:
        halos = first
    halos = jnp.transpose(halos, (0, 2, 1, 3))                      # (B, num_t, C_in, P)

    lpad = _round_up(P, 128)   # pad halo lanes so the x-tile store is 128-lane aligned
    kernel = _make_conv_kernel(K, t_tile, P, lpad, dilation, out_dtype)

    return pl.pallas_call(
        kernel,
        out_shape=jax.ShapeDtypeStruct((B, C_out, T), out_dtype),
        grid_spec=pltpu.PrefetchScalarGridSpec(
            num_scalar_prefetch=0,
            grid=(B, num_t),
            in_specs=[
                pl.BlockSpec((1, C_in, t_tile), lambda b, t: (b, 0, t)),
                pl.BlockSpec((1, 1, C_in, P), lambda b, t: (b, t, 0, 0)),
                # TODO(synk): pipeline_mode=pl.Buffered(1) on the two resident specs
                # below would halve their VMEM footprint for very large C_out*K*C_in.
                pl.BlockSpec((K, C_out, C_in), lambda b, t: (0, 0, 0)),   # resident weight
                pl.BlockSpec((C_out, 1), lambda b, t: (0, 0)),            # resident bias
            ],
            out_specs=pl.BlockSpec((1, C_out, t_tile), lambda b, t: (b, 0, t)),
            scratch_shapes=[
                pltpu.VMEM((C_in, lpad + t_tile), x_c.dtype),             # haloed window
            ],
        ),
        compiler_params=compiler_params,
    )(x_c, halos, w3, bias2d)


def _reference_causal_conv1d(x, weight, bias, *, stride=1, dilation=1, pad_mode="reflect"):
    K = weight.shape[-1]
    causal_padding = dilation * (K - 1) + (1 - stride)
    x_pad = jnp.pad(x, ((0, 0), (0, 0), (causal_padding, 0)), mode=pad_mode)
    out = lax.conv_general_dilated(
        x_pad, weight,
        window_strides=(stride,),
        padding="VALID",
        rhs_dilation=(dilation,),
        dimension_numbers=("NCH", "OIH", "NCH"),
    )
    return out + bias.reshape(1, -1, 1)


if __name__ == "__main__":
    key = jax.random.PRNGKey(0)
    kx, kw, kb, kx2, kw2, kb2, kx3, kw3, kb3 = jax.random.split(key, 9)

    # Test 1: module-default small config (B=2, C_in=4, C_out=8, T=16, K=3, reflect pad).
    B, C_in, C_out, T = 2, 4, 8, 16
    K, stride, dilation = 3, 1, 1
    x = jax.random.normal(kx, (B, C_in, T), dtype=jnp.float32)
    bound = 1.0 / (C_in * K) ** 0.5
    weight = jax.random.uniform(kw, (C_out, C_in, K), minval=-bound, maxval=bound, dtype=jnp.float32)
    bias = jax.random.uniform(kb, (C_out,), minval=-bound, maxval=bound, dtype=jnp.float32)

    out = causal_conv1d(x, weight, bias, stride=stride, dilation=dilation)
    out = jax.block_until_ready(out)
    ref = _reference_causal_conv1d(x, weight, bias, stride=stride, dilation=dilation)
    assert out.shape == (B, C_out, T), out.shape
    assert jnp.allclose(out, ref, atol=1e-5, rtol=1e-5), "mismatch vs reference conv (test 1)"

    # Test 2: time-tiled + dilated path (multiple time tiles, halo gather, dilation=2).
    B2, C_in2, C_out2, T2, K2, dil2 = 2, 4, 8, 384, 3, 2
    x2 = jax.random.normal(kx2, (B2, C_in2, T2), dtype=jnp.float32)
    bound2 = 1.0 / (C_in2 * K2) ** 0.5
    weight2 = jax.random.uniform(kw2, (C_out2, C_in2, K2), minval=-bound2, maxval=bound2, dtype=jnp.float32)
    bias2 = jax.random.uniform(kb2, (C_out2,), minval=-bound2, maxval=bound2, dtype=jnp.float32)

    out2 = causal_conv1d(x2, weight2, bias2, stride=1, dilation=dil2, t_tile=128)
    out2 = jax.block_until_ready(out2)
    ref2 = _reference_causal_conv1d(x2, weight2, bias2, stride=1, dilation=dil2)
    assert out2.shape == (B2, C_out2, T2), out2.shape
    assert jnp.allclose(out2, ref2, atol=1e-5, rtol=1e-5), "mismatch vs reference conv (test 2)"

    # Test 3: pointwise (K=1) fast path — no halo / window scratch.
    B3, C_in3, C_out3, T3, K3 = 2, 4, 8, 16, 1
    x3 = jax.random.normal(kx3, (B3, C_in3, T3), dtype=jnp.float32)
    bound3 = 1.0 / (C_in3 * K3) ** 0.5
    weight3 = jax.random.uniform(kw3, (C_out3, C_in3, K3), minval=-bound3, maxval=bound3, dtype=jnp.float32)
    bias3 = jax.random.uniform(kb3, (C_out3,), minval=-bound3, maxval=bound3, dtype=jnp.float32)

    out3 = causal_conv1d(x3, weight3, bias3, stride=1, dilation=1)
    out3 = jax.block_until_ready(out3)
    ref3 = _reference_causal_conv1d(x3, weight3, bias3, stride=1, dilation=1)
    assert out3.shape == (B3, C_out3, T3), out3.shape
    assert jnp.allclose(out3, ref3, atol=1e-5, rtol=1e-5), "mismatch vs reference conv (test 3)"

    print("KERNEL_OK")
</pallas_src>

<mosaic_0001>
module attributes {stable_mosaic.version = 11 : i64} {
  func.func @kernel(%arg0: i32, %arg1: i32, %arg2: memref<1x4x16xf32, #tpu.memory_space<vmem>>, %arg3: memref<1x1x4x2xf32, #tpu.memory_space<vmem>>, %arg4: memref<3x8x4xf32, #tpu.memory_space<vmem>>, %arg5: memref<8x1xf32, #tpu.memory_space<vmem>>, %arg6: memref<1x8x16xf32, #tpu.memory_space<vmem>>, %arg7: memref<4x144xf32, #tpu.memory_space<vmem>>) attributes {dimension_semantics = [#tpu.dimension_semantics<parallel>, #tpu.dimension_semantics<parallel>], iteration_bounds = array<i64: 2, 1>, scalar_prefetch = 0 : i64, scratch_operands = 1 : i64, tpu.core_type = #tpu.core_type<tc>, window_params = [{transform_indices = @transform_0, window_bounds = array<i64: 1, 4, 16>}, {transform_indices = @transform_1, window_bounds = array<i64: 1, 1, 4, 2>}, {pipeline_mode = #tpu.pipeline_mode<synchronous>, transform_indices = @transform_2, window_bounds = array<i64: 3, 8, 4>}, {pipeline_mode = #tpu.pipeline_mode<synchronous>, transform_indices = @transform_3, window_bounds = array<i64: 8, 1>}, {transform_indices = @transform_4, window_bounds = array<i64: 1, 8, 16>}]} {
    %c0 = arith.constant 0 : index
    %c0_0 = arith.constant 0 : index
    %c0_1 = arith.constant 0 : index
    %c0_2 = arith.constant 0 : index
    %0 = vector.load %arg3[%c0, %c0_0, %c0_1, %c0_2] : memref<1x1x4x2xf32, #tpu.memory_space<vmem>>, vector<1x1x4x2xf32>
    %1 = vector.shape_cast %0 : vector<1x1x4x2xf32> to vector<4x2xf32>
    %c0_3 = arith.constant 0 : index
    %c126 = arith.constant 126 : index
    %2 = vector.load %arg7[%c0_3, %c126] : memref<4x144xf32, #tpu.memory_space<vmem>>, vector<4x2xf32>
    tpu.vector_store %arg7[%c0_3, %c126], %1 {strides = array<i32>} : memref<4x144xf32, #tpu.memory_space<vmem>>, vector<4x2xf32>,
    %c0_4 = arith.constant 0 : index
    %c0_5 = arith.constant 0 : index
    %c0_6 = arith.constant 0 : index
    %3 = vector.load %arg2[%c0_4, %c0_5, %c0_6] : memref<1x4x16xf32, #tpu.memory_space<vmem>>, vector<1x4x16xf32>
    %4 = vector.shape_cast %3 : vector<1x4x16xf32> to vector<4x16xf32>
    %c0_7 = arith.constant 0 : index
    %c128 = arith.constant 128 : index
    %5 = vector.load %arg7[%c0_7, %c128] : memref<4x144xf32, #tpu.memory_space<vmem>>, vector<4x16xf32>
    tpu.vector_store %arg7[%c0_7, %c128], %4 {strides = array<i32>} : memref<4x144xf32, #tpu.memory_space<vmem>>, vector<4x16xf32>,
    %c0_8 = arith.constant 0 : index
    %c0_9 = arith.constant 0 : index
    %c0_10 = arith.constant 0 : index
    %6 = vector.load %arg4[%c0_8, %c0_9, %c0_10] : memref<3x8x4xf32, #tpu.memory_space<vmem>>, vector<1x8x4xf32>
    %7 = vector.shape_cast %6 : vector<1x8x4xf32> to vector<8x4xf32>
    %c0_11 = arith.constant 0 : index
    %c126_12 = arith.constant 126 : index
    %8 = vector.load %arg7[%c0_11, %c126_12] : memref<4x144xf32, #tpu.memory_space<vmem>>, vector<4x16xf32>
    %cst = arith.constant dense<0.000000e+00> : vector<8x16xf32>
    %9 = tpu.matmul %7, %8, %cst {dimension_numbers = #tpu.dot_dimension_numbers<[1], [0], [0], [1], [0, 0, 1, 1], [], []>} : vector<8x4xf32>, vector<4x16xf32>, vector<8x16xf32> -> vector<8x16xf32>
    %c1 = arith.constant 1 : index
    %c0_13 = arith.constant 0 : index
    %c0_14 = arith.constant 0 : index
    %10 = vector.load %arg4[%c1, %c0_13, %c0_14] : memref<3x8x4xf32, #tpu.memory_space<vmem>>, vector<1x8x4xf32>
    %11 = vector.shape_cast %10 : vector<1x8x4xf32> to vector<8x4xf32>
    %c0_15 = arith.constant 0 : index
    %c127 = arith.constant 127 : index
    %12 = vector.load %arg7[%c0_15, %c127] : memref<4x144xf32, #tpu.memory_space<vmem>>, vector<4x16xf32>
    %cst_16 = arith.constant dense<0.000000e+00> : vector<8x16xf32>
    %13 = tpu.matmul %11, %12, %cst_16 {dimension_numbers = #tpu.dot_dimension_numbers<[1], [0], [0], [1], [0, 0, 1, 1], [], []>} : vector<8x4xf32>, vector<4x16xf32>, vector<8x16xf32> -> vector<8x16xf32>
    %14 = arith.addf %9, %13 : vector<8x16xf32>
    %c2 = arith.constant 2 : index
    %c0_17 = arith.constant 0 : index
    %c0_18 = arith.constant 0 : index
    %15 = vector.load %arg4[%c2, %c0_17, %c0_18] : memref<3x8x4xf32, #tpu.memory_space<vmem>>, vector<1x8x4xf32>
    %16 = vector.shape_cast %15 : vector<1x8x4xf32> to vector<8x4xf32>
    %c0_19 = arith.constant 0 : index
    %c128_20 = arith.constant 128 : index
    %17 = vector.load %arg7[%c0_19, %c128_20] : memref<4x144xf32, #tpu.memory_space<vmem>>, vector<4x16xf32>
    %cst_21 = arith.constant dense<0.000000e+00> : vector<8x16xf32>
    %18 = tpu.matmul %16, %17, %cst_21 {dimension_numbers = #tpu.dot_dimension_numbers<[1], [0], [0], [1], [0, 0, 1, 1], [], []>} : vector<8x4xf32>, vector<4x16xf32>, vector<8x16xf32> -> vector<8x16xf32>
    %19 = arith.addf %14, %18 : vector<8x16xf32>
    %c0_22 = arith.constant 0 : index
    %c0_23 = arith.constant 0 : index
    %20 = vector.load %arg5[%c0_22, %c0_23] : memref<8x1xf32, #tpu.memory_space<vmem>>, vector<8x1xf32>
    %21 = vector.broadcast %20 : vector<8x1xf32> to vector<8x16xf32>
    %22 = arith.addf %19, %21 : vector<8x16xf32>
    %c0_24 = arith.constant 0 : index
    %c0_25 = arith.constant 0 : index
    %c0_26 = arith.constant 0 : index
    %23 = vector.load %arg6[%c0_24, %c0_25, %c0_26] : memref<1x8x16xf32, #tpu.memory_space<vmem>>, vector<1x8x16xf32>
    %24 = vector.shape_cast %23 : vector<1x8x16xf32> to vector<8x16xf32>
    %25 = vector.shape_cast %22 : vector<8x16xf32> to vector<1x8x16xf32>
    tpu.vector_store %arg6[%c0_24, %c0_25, %c0_26], %25 {strides = array<i32>} : memref<1x8x16xf32, #tpu.memory_space<vmem>>, vector<1x8x16xf32>,
    return
  }
  func.func @transform_0(%arg0: i32, %arg1: i32) -> (i32, i32, i32) {
    %c0_i32 = arith.constant 0 : i32
    %c0_i32_0 = arith.constant 0 : i32
    return %arg0, %c0_i32, %arg1 : i32, i32, i32
  }
  func.func @transform_1(%arg0: i32, %arg1: i32) -> (i32, i32, i32, i32) {
    %c0_i32 = arith.constant 0 : i32
    %c0_i32_0 = arith.constant 0 : i32
    %c0_i32_1 = arith.constant 0 : i32
    return %arg0, %arg1, %c0_i32, %c0_i32_0 : i32, i32, i32, i32
  }
  func.func @transform_2(%arg0: i32, %arg1: i32) -> (i32, i32, i32) {
    %c0_i32 = arith.constant 0 : i32
    %c0_i32_0 = arith.constant 0 : i32
    %c0_i32_1 = arith.constant 0 : i32
    %c0_i32_2 = arith.constant 0 : i32
    return %c0_i32, %c0_i32_0, %c0_i32_1 : i32, i32, i32
  }
  func.func @transform_3(%arg0: i32, %arg1: i32) -> (i32, i32) {
    %c0_i32 = arith.constant 0 : i32
    %c0_i32_0 = arith.constant 0 : i32
    %c0_i32_1 = arith.constant 0 : i32
    return %c0_i32, %c0_i32_0 : i32, i32
  }
  func.func @transform_4(%arg0: i32, %arg1: i32) -> (i32, i32, i32) {
    %c0_i32 = arith.constant 0 : i32
    %c0_i32_0 = arith.constant 0 : i32
    return %arg0, %c0_i32, %arg1 : i32, i32, i32
  }
}

</mosaic_0001>

<bundles_post_ra>
// kernel: tpu_custom_call.1
= control target key start
LH: loop header
LB: loop body
LE: loop exit
PB: predicated region body
PF: predicated region fallthrough
CT: control target
= control target key end

     0   :  { %9 = vsyncpa [#allocation4], 0  ;;  %s954_s0 = inlined_call_operand.vmem [shape: f32[2,4,16], index: 0, kind: input, shape index: {}]   ;;  %s955_s1 = inlined_call_operand.vmem [shape: f32[2,1,4,2], index: 1, kind: input, shape index: {}]   ;;  %s956_s2 = inlined_call_operand.vmem [shape: f32[3,8,4], index: 2, kind: input, shape index: {}]   ;;  %s957_s3 = inlined_call_operand.vmem [shape: f32[8,1], index: 3, kind: input, shape index: {}]   ;;  %s958_s4 = inlined_call_operand.hbm [shape: f32[2,8,16], index: 4, kind: output, shape index: {}]  }
   0x1   :  { %11 = vsyncpa [#allocation4 + $0x1], 0  ;;  %s831_s15 = smov 0   ;;  %s833_s16 = smov 0  }
   0x2   :  { %s835_s17 = smov 0   ;;  %s837_s18 = smov 0  }
   0x3   :  { %s839_s19 = smov 0   ;;  %s841_s20 = smov 0  }
   0x4 LB: > { %s616_s21 = sadd.s32 4294967295, %s797_s20   ;;  %s617_s22 = sadd.s32 4294967294, %s797_s20   ;;  %s797_s20 = sphi %s841_s20, %s17_s20   ;;  %s793_s19 = sphi %s839_s19, %s965_s19   ;;  %s789_s18 = sphi %s837_s18, %s964_s18   ;;  %s785_s17 = sphi %s835_s17, %s963_s17   ;;  %s781_s16 = sphi %s833_s16, %s962_s16   ;;  %s777_s15 = sphi %s831_s15, %s961_s15  }
   0x5   : > { %s29_s23 = sadd.s32 1, %s793_s19  ;;  %s136_s24 = sadd.s32 1, %s785_s17 }
   0x6   : > { %p31_p0 = scmp.ge.s32.totalorder %s29_s23, 2  ;;  %p146_p1 = scmp.ne.s32.totalorder %s785_s17, %s781_s16 }
   0x7   : > { %p147_p2 = scmp.eq.s32.totalorder %s616_s21, 1  ;;  %p152_p3 = scmp.ne.s32.totalorder %s781_s16, %s777_s15 }
   0x8   : > { %s967_s23 = smov (%p31_p0, %s29_s23), 0  ;;  %p153_p5 = scmp.eq.s32.totalorder %s617_s22, 1 }
   0x9   : > { %p871_p4 = por %p147_p2, %p146_p1  ;;  %s131_s26 = ssub.s32 %s793_s19, %s967_s23 }
   0xa   : > { %p620_p6 = scmp.ge.s32.totalorder %s797_s20, 1  ;;  %p134_p7 = scmp.eq.s32.totalorder %s131_s26, 0 }
   0xb   : > { %p878_p8 = por %p153_p5, %p152_p3  ;;  %p197_p9 = scmp.lt.s32.totalorder %s797_s20, 3 }
   0xc   : > { %s884_s28 = scalar_select %p134_p7, %s785_s17, %s136_s24  }
   0xd   : > { %p198_p10 = pnand %p620_p6, %p197_p9 }
   0xe   : > { %p232_p11 = scmp.lt.s32.totalorder (!%p198_p10), %s789_s18, 1  ;;  %s799_s11 = smov (!%p198_p10), 126  }
   0xf   : > { %201 = sbr.rel (%p198_p10) target bundleno = 483 (0x1e3), region = 36  ;;  %s803_s12 = smov (!%p198_p10), 1  }
  0x10   : > { %s804_s13 = smov (!%p198_p10), 2   ;;  %s229_s6 = sand.u32 (!%p198_p10), 1, %s781_s16  }
  0x11   : > { %s633_s8 = sshll.u32 (!%p198_p10), %s789_s18, 7  ;;  %s516_s14 = scalar_lea.sflag (!%p198_p10), [#allocation4], %s229_s6 }
  0x12   : > { %s805_s22 = smov (!%p198_p10), [#allocation3]  }
  0x13   : > { %s725_s24 = sshll.u32 (!%p198_p10), %s805_s22, 4  ;;  %s726_s24 = int_to_ptr.vmem [resolvable:$false] %s725_s24 }
  0x14   : > { %s233_s29 = scalar_select %p232_p11, %s789_s18, 1  ;;  %vm254_vm0 = vcmask 125952   ;;  %vm251_vm1 = vcmask 1044464   ;;  %v800_v2 = vmov 0.0   ;;  %vm801_vm2 = vmmov 0   ;;  %v506_v7 = vld [vmem:[%s957_s3] sm:$0xff] }
  0x15   : > { %642 = vmatprep.subr.mxu0 %v800_v2  ;;  %644 = vmatprep.mubr.msk.f32.mxu0 %vm801_vm2, %v800_v2  ;;  %v802_v4 = vmov 0   ;;  %vm266_vm3 = vcmask 7168   ;;  %vm272_vm4 = vcmask 1043456   ;;  %v624_v10 = vld [vmem:[%s956_s2 + $0x8] sm:$0xff]  ;;  %vm268_vm5 = vcmask 31744   ;;  %v256_v15 = vld [vmem:[%s956_s2] sm:$0xff] }
  0x16   : > { %s622_s30 = sshll.u32 %s233_s29, 2  ;;  %647 = vmatprep.subr.mxu1 %v800_v2  ;;  %649 = vmatprep.mubr.msk.f32.mxu1 %vm801_vm2, %v800_v2  ;;  %vm349_vm6 = vcmask 15360   ;;  %v629_v16 = vld [vmem:[%s956_s2 + $0x10] sm:$0xff]  ;;  %vm513_vm7 = vcmask 130048   ;;  %s727_s18 = scalar_lea.vmem %s726_s24, 256 }
  0x17   : > { %s245_s7 = scalar_lea.vmem %s955_s1, %s622_s30  ;;  %s238_s10 = scalar_lea.vmem %s954_s0, %s622_s30  ;;  %718 = vset.pattern.permute.xlu1 %v802_v4  ;;  %719 = vset.pattern.permute.xlu0 %v802_v4 }
  0x18   : > { %v246_v0 = vld [vmem:[%s245_s7] sm:$0xf]  ;;  %s621_s7 = sshll.u32 %s229_s6, 3 }
  0x19   : > { %v253_v1 = vld [vmem:[%s238_s10] sm:$0xf]  ;;  %248 = vrot.lane.b32.xlu0 %v246_v0, %s799_s11  ;;  %s231_s9 = scalar_lea.vmem [#allocation3], %s621_s7 }
  0x1a   : > { %255 = vst.msk [vmem:[#allocation2 + $0x4] sm:$0xf] %vm254_vm0, %v253_v1  ;;  %s530_s10 = sshll.u32 %s231_s9, 4  ;;  %s531_s10 = int_to_ptr.vmem [resolvable:$true] %s530_s10 }
  0x1b   : > { %s721_s21 = scalar_lea.vmem %s531_s10, 128  ;;  %p728_p1 = scmp.lt.s32.totalorder %s531_s10, %s726_s24 }
  0x1c   : > { %p722_p12 = scmp.ne.s32.totalorder %s531_s10, %s721_s21  ;;  %p729_p2 = scmp.lt.s32.totalorder %s727_s18, %s721_s21 }
  0x1e   : > { %p723_p13 = pnand %p722_p12, %p871_p4  ;;  %p730_p3 = por %p729_p2, %p728_p1 }
  0x20   : > { %p724_p0 = pneg %p723_p13 }
  0x21   : > { %v428_v12 = vld [vmem:[#allocation2 + $0x4] sm:$0xf] }
  0x22   : > { %p731_p5 = pnand %p730_p3, %p724_p0 }
  0x8b   : > { %v249_v3 = vpop.permute.xlu0 %248 }
  0x8c   : > { %252 = vst.msk [vmem:[#allocation2] sm:$0xf] %vm251_vm1, %v249_v3 }
  0x93   : > { %v257_v5 = vld [vmem:[#allocation2] sm:$0xff] }
  0x94   : > { %262 = vrot.lane.b32.xlu0 %v257_v5, %s803_s12  ;;  %v261_v6 = vcombine.high %v257_v5, %v257_v5 }
  0x96   : > { %264 = vrot.lane.b32.xlu1 %v261_v6, %s803_s12 }
  0x98   : > { %347 = vrot.lane.b32.xlu0 %v261_v6, %s804_s13 }
  0x9a   : > { %345 = vrot.lane.b32.xlu1 %v257_v5, %s804_s13  ;;  %s528_s13 = scalar_lea.hbm %s958_s4, %s633_s8 }
  0x9e   : > { %509 = vperm.xlu1 %718, %v506_v7  }
 0x106   : > { %v263_v8 = vpop.permute.xlu0 %262 }
 0x108   : > { %v265_v9 = vpop.permute.xlu1 %264 }
 0x109   : > { %v267_v11 = vsel %vm266_vm3, %v263_v8, %v265_v9 }
 0x10a   : > { %643 = vmatpush3.msk.msra.mxu0 %vm272_vm4, %v267_v11  ;;  %v348_v13 = vpop.permute.xlu0 %347 }
 0x10b   : > { %645 = vmatmul.mubr.msk.f32.vlgmr.msra.gmra.mxu0 %vm268_vm5, %v624_v10  ;;  %652 = vmatprep.subr.mxu0 %v800_v2 }
 0x10c   : > { %v346_v14 = vpop.permute.xlu1 %345  ;;  %653 = vmatpush3.msk.msra.mxu0 %vm272_vm4, %v428_v12  ;;  %654 = vmatprep.mubr.msk.f32.mxu0 %vm801_vm2, %v800_v2 }
 0x10d   : > { %v350_v17 = vsel %vm349_vm6, %v346_v14, %v348_v13 }
 0x10e   : > { %648 = vmatpush3.msk.msra.mxu1 %vm272_vm4, %v350_v17 }
 0x10f   : > { %650 = vmatmul.mubr.msk.f32.vlgmr.msra.gmra.mxu1 %vm268_vm5, %v256_v15  ;;  %655 = vmatmul.mubr.msk.f32.vlgmr.msra.gmra.mxu0 %vm268_vm5, %v629_v16 }
 0x119   : > { %v510_v23 = vpop.permute.xlu1 %509 }
 0x1cb   : > { %v341_v18 = vpop.f32.mrf.mxu0 }
 0x1cd   : > { %v646_v19 = vpop.f32.mrf.mxu0 }
 0x1cf   : > { %v422_v20 = vpop.f32.mrf.mxu1  ;;  %v501_v21 = vpop.f32.mrf.mxu0 }
 0x1d0   : > { %v423_v22 = vadd.f32 %v422_v20, %v341_v18 }
 0x1d1   : > { %v651_v24 = vpop.f32.mrf.mxu1  ;;  %v656_v25 = vpop.f32.mrf.mxu0 }
 0x1d2   : > { %v505_v26 = vadd.f32 %v501_v21, %v423_v22 }
 0x1d4   : > { %v512_v27 = vadd.f32 %v510_v23, %v505_v26 }
 0x1d6   : > { %514 = vst.msk [vmem:[%s231_s9] sm:$0xff] %vm513_vm7, %v512_v27 }
 0x1d7   : > { %734 = shalt.err (!%p731_p5)
}
 0x1d8   : > { %s735_s26 = scalar_lea.hbm %s528_s13, 128  ;;  %s739_s5 = scalar_lea.hbm %s958_s4, 256 }
 0x1d9   : > { %p736_p6 = scmp.ne.s32.totalorder %s528_s13, %s735_s26  ;;  %p740_p10 = scmp.lt.s32.totalorder %s528_s13, %s958_s4 }
 0x1da   : > { %p741_p11 = scmp.lt.s32.totalorder %s739_s5, %s735_s26 }
 0x1db   : > { %p737_p7 = pnand %p736_p6, %p871_p4 }
 0x1dc   : > { %p742_p12 = por %p741_p11, %p740_p10 }
 0x1dd   : > { %p738_p9 = pneg %p737_p7 }
 0x1df   : > { %p743_p13 = pnand %p742_p12, %p738_p9 }
 0x1e1   : > { %746 = shalt.err (!%p743_p13)
}
 0x1e2   : > { %657 = dma.vmem_to_hbm [thread:$0]  (%p871_p4), %s531_s10, 128, %s528_s13, %s516_s14  }
 0x1e3 PF: > { %p663_p0 = scmp.ge.s32.totalorder %s797_s20, 2  ;;  %s542_s8 = sand.u32 1, %s777_s15  }
 0x1e4   : > { %s543_s9 = scalar_lea.sflag [#allocation4], %s542_s8 }
 0x1e5   : > { %p660_p1 = pnand %p663_p0, %p878_p8 }
 0x1e7   : > { %p661_p2 = pneg %p660_p1 }
 0x1e9   : > { %772 = dma.done.wait (%p661_p2), %s543_s9, 128  }
 0x1ea   : > { %774 = vsyncadd (%p661_p2), %s543_s9, 4294967168  ;;  %s17_s20 = sadd.s32 1, %s797_s20   ;;  %s961_s15 = smov %s781_s16 }
 0x1eb   : > { %p14_p3 = scmp.ge.s32.totalorder %s17_s20, 4   ;;  %s962_s16 = smov %s785_s17 }
 0x1ec   : > { %s963_s17 = smov %s884_s28  ;;  %s964_s18 = smov %s793_s19 }
 0x1ed   : > { %s965_s19 = smov %s967_s23  ;;  %16 = sbr.rel (!%p14_p3) target bundleno = 4 (0x4), region = 76 }
 0x1f2   :  { %548 = vsyncpa [#allocation4], 1 }
 0x1f3   :  { %550 = vsyncpa [#allocation4 + $0x1], 1 }

</bundles_post_ra>
